<compile_context>
chip_gen: v7x
topology: tpu7x:2x2x1
jax: 0.10.0
libtpu: 0.0.40
codegen_flags: <defaults>
</compile_context>

<pallas_src>
import functools
from dataclasses import dataclass, field
from typing import Any, Callable, Dict, List, Optional, Tuple

import jax
import jax.numpy as jnp
from jax.experimental import pallas as pl
from jax.experimental.pallas import tpu as pltpu


# -----------------------------------------------------------------------------
# Small helpers
# -----------------------------------------------------------------------------
def _round_up(x: int, m: int) -> int:
    return ((x + m - 1) // m) * m


@functools.lru_cache(maxsize=None)
def _vmem_capacity_bytes() -> int:
    """Per-TensorCore VMEM capacity; conservative (v7x) fallback if unknown."""
    try:
        info = pltpu.get_tpu_info()
        v = getattr(info, "vmem_capacity_bytes", None)
        if v:
            return int(v)
    except Exception:
        pass
    return 64 * 1024 * 1024


def _pick_tile(dim: int, cap: int, align: int) -> int:
    """Largest `align`-multiple tile <= cap dividing dim.

    Dims are pre-padded to a multiple of `align` at capture time, so an
    aligned divisor always exists (worst case `align` itself)."""
    if dim <= cap:
        return dim
    t = (min(cap, dim) // align) * align
    while t >= align:
        if dim % t == 0:
            return t
        t -= align
    return align


# -----------------------------------------------------------------------------
# Pallas kernels: the "captured graph" hot path: out = (x @ W) * scale + bias
# -----------------------------------------------------------------------------
def _captured_matmul_single_kernel(scale_ref, x_ref, w_ref, b_ref, o_ref):
    # Whole problem resident in VMEM: one MXU pass, no accumulator scratch.
    acc = jnp.dot(x_ref[...], w_ref[...], preferred_element_type=jnp.float32)
    o_ref[...] = (acc * scale_ref[0] + b_ref[...]).astype(o_ref.dtype)


def _captured_matmul_tiled_kernel(scale_ref, x_ref, w_ref, b_ref, o_ref, acc_ref):
    k = pl.program_id(2)
    partial = jnp.dot(x_ref[...], w_ref[...], preferred_element_type=jnp.float32)

    @pl.when(k == 0)
    def _():
        # First K step writes directly — saves the tm×tn f32 zero-fill plus
        # the read-back of zeros per output tile.
        acc_ref[...] = partial

    @pl.when(k != 0)
    def _():
        acc_ref[...] += partial

    @pl.when(k == pl.num_programs(2) - 1)
    def _():
        scale = scale_ref[0]  # updatable task param, resident in SMEM
        o_ref[...] = (acc_ref[...] * scale + b_ref[...]).astype(o_ref.dtype)


# -----------------------------------------------------------------------------
# Kernel builder ("graph capture"): built & jitted once per shape/dtype/policy
# -----------------------------------------------------------------------------
@functools.lru_cache(maxsize=None)
def _build_captured_matmul(M: int, K: int, N: int,
                           compute_dtype_name: str, out_dtype_name: str,
                           force_path: Optional[str] = None,
                           tile_caps: Optional[Tuple[int, int, int]] = None):
    """Returns a jitted callable (scale[1], x[M,K], w[K,N], bias[1,N]) -> out[M,N].
    M, K, N are the (already tile-aligned) padded dims."""
    cdt = jnp.dtype(compute_dtype_name)
    odt = jnp.dtype(out_dtype_name)
    cit, oit = cdt.itemsize, odt.itemsize

    vmem_bytes = _vmem_capacity_bytes()
    low_vmem = vmem_bytes < 100 * 1024 * 1024            # v7x: 64 MiB/TC; v5e/v6e: 128 MiB
    gen_vmem_cap = (48 if low_vmem else 100) * 1024 * 1024

    flops = 2 * M * K * N
    footprint = M * K * cit + K * N * cit + N * 4 + M * N * oit

    single_cap = (12 if low_vmem else 20) * 1024 * 1024  # accounts for double-buffering
    use_single = (force_path == "single") or (force_path is None and footprint <= single_cap)

    if use_single:
        # --- small/medium-problem path: one kernel invocation, full-array blocks ---
        fn = pl.pallas_call(
            _captured_matmul_single_kernel,
            out_shape=jax.ShapeDtypeStruct((M, N), odt),
            grid_spec=pltpu.PrefetchScalarGridSpec(
                num_scalar_prefetch=1,          # scale -> SMEM before the grid runs
                grid=(1,),
                in_specs=[
                    pl.BlockSpec((M, K), lambda i, s: (0, 0)),   # x
                    pl.BlockSpec((K, N), lambda i, s: (0, 0)),   # w
                    pl.BlockSpec((1, N), lambda i, s: (0, 0)),   # bias
                ],
                out_specs=pl.BlockSpec((M, N), lambda i, s: (0, 0)),
            ),
            compiler_params=pltpu.CompilerParams(
                dimension_semantics=("arbitrary",),
                vmem_limit_bytes=int(min(max(3 * footprint, 8 * 1024 * 1024), gen_vmem_cap)),
            ),
            cost_estimate=pl.CostEstimate(
                flops=flops, transcendentals=0, bytes_accessed=footprint),
        )
        return jax.jit(fn)

    # --- production path: MXU-aligned large tiles, K-last reduction grid ---
    align_m = max(8, 32 // cit)          # 8 for f32, 16 for bf16, 32 for int8/fp8
    if tile_caps is not None:
        tm_cap, tn_cap, tk_cap = tile_caps
    else:
        tm_cap = tn_cap = 256 if low_vmem else 512
        tk_cap = 2048 if low_vmem else 4096
        if cit >= 4:                      # f32 compute: halve the K slab
            tk_cap //= 2

    tm = _pick_tile(M, tm_cap, align_m)
    tn = _pick_tile(N, tn_cap, 128)
    tk = _pick_tile(K, tk_cap, 128)

    # v7x megacore: a single (i, j) block leaves the second TensorCore idle.
    # Split N for compute-heavy shapes so the "parallel" axes yield >= 2 blocks.
    if low_vmem and tile_caps is None and (M // tm) * (N // tn) == 1 \
            and tn >= 256 and K >= 1024:
        tn //= 2

    grid = (M // tm, N // tn, K // tk)

    # VMEM budget: double-buffered inputs/outputs + f32 accumulator, with headroom.
    vmem_est = (2 * (tm * tk + tk * tn) * cit
                + 2 * (tn * 4 + tm * tn * oit)
                + tm * tn * 4)
    vmem_limit = int(min(max(2 * vmem_est, 32 * 1024 * 1024), gen_vmem_cap))

    bytes_accessed = (M * K * cit * (N // tn)      # x re-read per j block
                      + K * N * cit * (M // tm)    # w re-read per i block
                      + M * N * oit + N * 4)

    fn = pl.pallas_call(
        _captured_matmul_tiled_kernel,
        out_shape=jax.ShapeDtypeStruct((M, N), odt),
        grid_spec=pltpu.PrefetchScalarGridSpec(
            num_scalar_prefetch=1,                 # scale -> SMEM
            grid=grid,
            in_specs=[
                pl.BlockSpec((tm, tk), lambda i, j, k, s: (i, k)),   # x
                pl.BlockSpec((tk, tn), lambda i, j, k, s: (k, j)),   # w
                pl.BlockSpec((1, tn), lambda i, j, k, s: (0, j)),    # bias
            ],
            out_specs=pl.BlockSpec((tm, tn), lambda i, j, k, s: (i, j)),
            scratch_shapes=[pltpu.VMEM((tm, tn), jnp.float32)],
        ),
        compiler_params=pltpu.CompilerParams(
            # (i, j) parallel so v7x's 2 TensorCores split the work; K is the
            # resident-accumulator reduction axis.
            dimension_semantics=("parallel", "parallel", "arbitrary"),
            vmem_limit_bytes=vmem_limit,
        ),
        cost_estimate=pl.CostEstimate(
            flops=flops, transcendentals=0, bytes_accessed=bytes_accessed),
    )
    return jax.jit(fn)


# -----------------------------------------------------------------------------
# Stand-ins for the ACL captured-graph machinery
# -----------------------------------------------------------------------------
class _ReplayGraph:
    """Models a captured graph: static input/weight buffers (cast to the
    compute dtype and tile-padded once at capture time), a static output
    buffer, and per-node updatable task params.  The pallas_call is built and
    jitted once at "capture"; replay() only re-dispatches it with the
    *current* task params."""

    def __init__(self, x, w, b, init_scale: float,
                 compute_dtype=jnp.bfloat16,
                 force_path: Optional[str] = None,
                 tile_caps: Optional[Tuple[int, int, int]] = None):
        x = jnp.asarray(x)
        w = jnp.asarray(w)
        b = jnp.asarray(b)
        M, K = x.shape
        Kw, N = w.shape
        assert K == Kw, "x/w contraction dims must match"

        out_dtype = x.dtype
        cdt = jnp.dtype(compute_dtype) if compute_dtype is not None else jnp.dtype(x.dtype)

        # Capture-time cast (halves HBM traffic per replay) + zero-padding to
        # tile-aligned shapes so every block is a full, unmasked vreg tile.
        align_m = max(8, 32 // cdt.itemsize)
        Mp, Kp, Np = _round_up(M, align_m), _round_up(K, 128), _round_up(N, 128)

        xc = x.astype(cdt)
        wc = w.astype(cdt)
        bc = b.reshape(1, N).astype(jnp.float32)
        if (Mp, Kp) != (M, K):
            xc = jnp.zeros((Mp, Kp), cdt).at[:M, :K].set(xc)
        if (Kp, Np) != (K, N):
            wc = jnp.zeros((Kp, Np), cdt).at[:K, :N].set(wc)
        if Np != N:
            bc = jnp.zeros((1, Np), jnp.float32).at[:, :N].set(bc)
        self._x, self._w, self._b = xc, wc, bc

        self._node_params: Dict[str, Dict[str, Any]] = {
            "scaled_matmul": {"scale": jnp.asarray([init_scale], jnp.float32)}
        }

        # "Capture": one-time kernel construction + jit (cached per shape/policy).
        launch = _build_captured_matmul(
            Mp, Kp, Np, cdt.name, jnp.dtype(out_dtype).name, force_path, tile_caps)
        if (Mp, Np) != (M, N):
            inner = launch
            launch = jax.jit(lambda s, xx, ww, bb: inner(s, xx, ww, bb)[:M, :N])
        self._launch = launch

        # TODO(synk): the real captured graph reuses a static output buffer;
        # input_output_aliases / buffer donation could pin that HBM allocation.
        self.static_output = None

    def replay(self):
        scale = self._node_params["scaled_matmul"]["scale"]
        self.static_output = self._launch(scale, self._x, self._w, self._b)

    def graph_task_update(self, node_name: str, **kwargs):
        """Equivalent of node_info.updated_func: patch a captured node's
        task params (takes effect on subsequent replay())."""
        self._node_params[node_name].update(
            {k: jnp.asarray(v, jnp.float32).reshape(1) for k, v in kwargs.items()}
        )


@dataclass
class _UpdatedNodeInfo:
    node_name: str
    updated_func: Callable
    updated_param_name: List[str]
    args: Tuple = ()
    kwargs: Dict[str, Any] = field(default_factory=dict)
    handle: Any = None   # NPU task handle — no Pallas equivalent
    event: Any = None    # NPU event — no Pallas equivalent


# -----------------------------------------------------------------------------
# CapturedGraphUpdateAndReplay — same forward control flow as the PyTorch module
# -----------------------------------------------------------------------------
class CapturedGraphUpdateAndReplay:
    def __init__(self, replay_graph: Any, updated_input_func: Callable,
                 updated_node_infos: List[_UpdatedNodeInfo]):
        self._replay_graph = replay_graph
        self._updated_input_func = updated_input_func
        self._updated_node_infos = updated_node_infos
        # TODO(synk): torch.npu.Stream()/current_stream() have no Pallas/JAX
        # equivalent; parameter updates are applied synchronously here.

    def __call__(self, *args: Any, **kwargs: Any):
        return self.forward(*args, **kwargs)

    def forward(self, *args: Any, **kwargs: Any):
        self._replay_graph.replay()
        updated_kwargs = self._updated_input_func(*args, **kwargs)
        if len(updated_kwargs) == 0:
            return
        # TODO(synk): graph_task_update_begin/end, set_stream and record_event
        # are NPU stream-capture APIs with no Pallas equivalent; the param
        # update itself is applied directly to the captured graph's task params.
        for node_info in self._updated_node_infos:
            node_kwargs = dict(node_info.kwargs)
            for key in node_info.updated_param_name:
                node_kwargs[key] = updated_kwargs[node_info.node_name][key]
            node_info.updated_func(*node_info.args, **node_kwargs)
        return  # matches the original: forward returns None


# -----------------------------------------------------------------------------
# Main
# -----------------------------------------------------------------------------
if __name__ == "__main__":
    # ---- test 1: small shapes, single-invocation path, update-and-replay ----
    M, K, N = 8, 256, 128
    kx, kw, kb = jax.random.split(jax.random.PRNGKey(0), 3)
    x = jax.random.normal(kx, (M, K), dtype=jnp.float32)
    w = jax.random.normal(kw, (K, N), dtype=jnp.float32) * 0.05
    b = jax.random.normal(kb, (1, N), dtype=jnp.float32)

    graph = _ReplayGraph(x, w, b, init_scale=1.0)

    node_info = _UpdatedNodeInfo(
        node_name="scaled_matmul",
        updated_func=graph.graph_task_update,
        updated_param_name=["scale"],
        args=("scaled_matmul",),
        kwargs={"scale": 1.0},
    )

    def updated_input_func(new_scale):
        # Computes updated op params from the runtime call args.
        return {"scaled_matmul": {"scale": new_scale}}

    module = CapturedGraphUpdateAndReplay(graph, updated_input_func, [node_info])

    # Reference against the bf16-rounded inputs (kernel accumulates in f32).
    xb = x.astype(jnp.bfloat16).astype(jnp.float32)
    wb = w.astype(jnp.bfloat16).astype(jnp.float32)

    def ref(scale):
        return jnp.dot(xb, wb, precision=jax.lax.Precision.HIGHEST) * scale + b

    # Call 1: replay uses the originally captured scale (1.0), then the update
    # patches scale -> 2.0 for the next replay (graph_task_update semantics).
    module(jnp.float32(2.0))
    out1 = jax.block_until_ready(graph.static_output)
    assert out1.shape == (M, N)
    assert jnp.allclose(out1, ref(1.0), rtol=1e-2, atol=1e-2), "replay #1 mismatch"

    # Call 2: replay now runs with the updated scale (2.0).
    module(jnp.float32(3.0))
    out2 = jax.block_until_ready(graph.static_output)
    assert jnp.allclose(out2, ref(2.0), rtol=1e-2, atol=1e-2), "replay #2 mismatch"

    # ---- test 2: forced tiled path (K accumulation + parallel (i, j) axes) ----
    M2, K2, N2 = 256, 1024, 512
    k2x, k2w, k2b = jax.random.split(jax.random.PRNGKey(1), 3)
    x2 = jax.random.normal(k2x, (M2, K2), dtype=jnp.float32) * 0.1
    w2 = jax.random.normal(k2w, (K2, N2), dtype=jnp.float32) * 0.02
    b2 = jax.random.normal(k2b, (1, N2), dtype=jnp.float32)

    graph2 = _ReplayGraph(x2, w2, b2, init_scale=0.5,
                          force_path="tiled", tile_caps=(128, 256, 256))
    graph2.replay()
    out3 = jax.block_until_ready(graph2.static_output)
    x2b = x2.astype(jnp.bfloat16).astype(jnp.float32)
    w2b = w2.astype(jnp.bfloat16).astype(jnp.float32)
    ref3 = jnp.dot(x2b, w2b, precision=jax.lax.Precision.HIGHEST) * 0.5 + b2
    assert jnp.allclose(out3, ref3, rtol=2e-2, atol=2e-2), "tiled replay mismatch"

    # ---- test 3: non-tile-aligned shape (exercises capture-time padding) ----
    M3, K3, N3 = 120, 520, 200
    k3x, k3w, k3b = jax.random.split(jax.random.PRNGKey(2), 3)
    x3 = jax.random.normal(k3x, (M3, K3), dtype=jnp.float32) * 0.1
    w3 = jax.random.normal(k3w, (K3, N3), dtype=jnp.float32) * 0.05
    b3 = jax.random.normal(k3b, (1, N3), dtype=jnp.float32)

    graph3 = _ReplayGraph(x3, w3, b3, init_scale=1.5)
    graph3.replay()
    out4 = jax.block_until_ready(graph3.static_output)
    x3b = x3.astype(jnp.bfloat16).astype(jnp.float32)
    w3b = w3.astype(jnp.bfloat16).astype(jnp.float32)
    ref4 = jnp.dot(x3b, w3b, precision=jax.lax.Precision.HIGHEST) * 1.5 + b3
    assert out4.shape == (M3, N3)
    assert jnp.allclose(out4, ref4, rtol=2e-2, atol=2e-2), "padded replay mismatch"

    print("KERNEL_OK")
</pallas_src>

<mosaic_0001>
module attributes {stable_mosaic.version = 11 : i64} {
  func.func @_captured_matmul_single_kernel(%arg0: i32, %arg1: memref<1xf32, #tpu.memory_space<smem>>, %arg2: memref<16x256xbf16, #tpu.memory_space<vmem>>, %arg3: memref<256x128xbf16, #tpu.memory_space<vmem>>, %arg4: memref<1x128xf32, #tpu.memory_space<vmem>>, %arg5: memref<16x128xf32, #tpu.memory_space<vmem>>) attributes {dimension_semantics = [#tpu.dimension_semantics<arbitrary>], iteration_bounds = array<i64: 1>, scalar_prefetch = 1 : i64, scratch_operands = 0 : i64, tpu.core_type = #tpu.core_type<tc>, window_params = [{pipeline_mode = #tpu.pipeline_mode<synchronous>, transform_indices = @transform_0, window_bounds = array<i64: 16, 256>}, {pipeline_mode = #tpu.pipeline_mode<synchronous>, transform_indices = @transform_1, window_bounds = array<i64: 256, 128>}, {pipeline_mode = #tpu.pipeline_mode<synchronous>, transform_indices = @transform_2, window_bounds = array<i64: 1, 128>}, {pipeline_mode = #tpu.pipeline_mode<synchronous>, transform_indices = @transform_3, window_bounds = array<i64: 16, 128>}]} {
    %c0 = arith.constant 0 : index
    %c0_0 = arith.constant 0 : index
    %0 = vector.load %arg2[%c0, %c0_0] : memref<16x256xbf16, #tpu.memory_space<vmem>>, vector<16x256xbf16>
    %c0_1 = arith.constant 0 : index
    %c0_2 = arith.constant 0 : index
    %1 = vector.load %arg3[%c0_1, %c0_2] : memref<256x128xbf16, #tpu.memory_space<vmem>>, vector<256x128xbf16>
    %cst = arith.constant dense<0.000000e+00> : vector<16x128xf32>
    %2 = tpu.matmul %0, %1, %cst {dimension_numbers = #tpu.dot_dimension_numbers<[1], [0], [0], [1], [0, 0, 1, 1], [], []>} : vector<16x256xbf16>, vector<256x128xbf16>, vector<16x128xf32> -> vector<16x128xf32>
    %c0_3 = arith.constant 0 : index
    %3 = memref.load %arg1[%c0_3] : memref<1xf32, #tpu.memory_space<smem>>
    %4 = vector.broadcast %3 : f32 to vector<16x128xf32>
    %5 = arith.mulf %2, %4 : vector<16x128xf32>
    %c0_4 = arith.constant 0 : index
    %c0_5 = arith.constant 0 : index
    %6 = vector.load %arg4[%c0_4, %c0_5] : memref<1x128xf32, #tpu.memory_space<vmem>>, vector<1x128xf32>
    %7 = vector.broadcast %6 : vector<1x128xf32> to vector<16x128xf32>
    %8 = arith.addf %5, %7 : vector<16x128xf32>
    %c0_6 = arith.constant 0 : index
    %c0_7 = arith.constant 0 : index
    %9 = vector.load %arg5[%c0_6, %c0_7] : memref<16x128xf32, #tpu.memory_space<vmem>>, vector<16x128xf32>
    tpu.vector_store %arg5[%c0_6, %c0_7], %8 {strides = array<i32>} : memref<16x128xf32, #tpu.memory_space<vmem>>, vector<16x128xf32>,
    return
  }
  func.func @transform_0(%arg0: i32, %arg1: memref<1xf32, #tpu.memory_space<smem>>) -> (i32, i32) {
    %c0_i32 = arith.constant 0 : i32
    %c0_i32_0 = arith.constant 0 : i32
    %c0_i32_1 = arith.constant 0 : i32
    return %c0_i32, %c0_i32_0 : i32, i32
  }
  func.func @transform_1(%arg0: i32, %arg1: memref<1xf32, #tpu.memory_space<smem>>) -> (i32, i32) {
    %c0_i32 = arith.constant 0 : i32
    %c0_i32_0 = arith.constant 0 : i32
    %c0_i32_1 = arith.constant 0 : i32
    return %c0_i32, %c0_i32_0 : i32, i32
  }
  func.func @transform_2(%arg0: i32, %arg1: memref<1xf32, #tpu.memory_space<smem>>) -> (i32, i32) {
    %c0_i32 = arith.constant 0 : i32
    %c0_i32_0 = arith.constant 0 : i32
    %c0_i32_1 = arith.constant 0 : i32
    return %c0_i32, %c0_i32_0 : i32, i32
  }
  func.func @transform_3(%arg0: i32, %arg1: memref<1xf32, #tpu.memory_space<smem>>) -> (i32, i32) {
    %c0_i32 = arith.constant 0 : i32
    %c0_i32_0 = arith.constant 0 : i32
    %c0_i32_1 = arith.constant 0 : i32
    return %c0_i32, %c0_i32_0 : i32, i32
  }
}

</mosaic_0001>

<bundles_post_ra>
// kernel: tpu_custom_call.1
= control target key start
LH: loop header
LB: loop body
LE: loop exit
PB: predicated region body
PF: predicated region fallthrough
CT: control target
= control target key end

     0   :  { %10 = vsyncpa [#allocation5], 0  ;;  %s479_s0 = inlined_call_operand.<no memory space> [shape: f32[1], index: 0, kind: input, shape index: {}]   ;;  %s480_s1 = inlined_call_operand.hbm [shape: bf16[16,256], index: 1, kind: input, shape index: {}]   ;;  %s481_s2 = inlined_call_operand.hbm [shape: bf16[256,128], index: 2, kind: input, shape index: {}]   ;;  %s482_s3 = inlined_call_operand.vmem [shape: f32[1,128], index: 3, kind: input, shape index: {}]   ;;  %s483_s4 = inlined_call_operand.hbm [shape: f32[16,128], index: 4, kind: output, shape index: {}]  }
   0x1   :  { %11 = vsyncpa [#allocation8], 0 }
   0x2   :  { %12 = vsyncpa [#allocation6], 0  ;;  %s399_s15 = smov [#allocation4]   ;;  %s327_s19 = scalar_lea.hbm %s480_s1, 256 }
   0x3   :  { %s18_s16 = sshll.u32 %s399_s15, 4  ;;  %p328_p0 = scmp.ne.s32.totalorder %s480_s1, %s327_s19  ;;  %s19_s16 = int_to_ptr.vmem [resolvable:$true] %s18_s16 }
   0x4   :  { %p331_p1 = scmp.lt.u32.totalorder %s327_s19, %s480_s1 }
   0x6   :  { %p333_p2 = pnand %p331_p1, %p328_p0 }
   0x8   :  { %336 = shalt.err (!%p333_p2)
}
   0x9   :  { %s337_s24 = scalar_lea.vmem %s19_s16, 256  ;;  %p342_p4 = scmp.lt.s32.totalorder %s19_s16, %s19_s16 }
   0xa   :  { %p338_p3 = scmp.ne.s32.totalorder %s19_s16, %s337_s24  ;;  %p343_p5 = scmp.lt.s32.totalorder %s337_s24, %s337_s24 }
   0xc   :  { %p344_p6 = por %p343_p5, %p342_p4 }
   0xe   :  { %p345_p7 = pnand %p344_p6, %p338_p3 }
  0x10   :  { %348 = shalt.err (!%p345_p7)
}
  0x11   :  { %s400_s25 = smov 128   ;;  %s401_s26 = smov 8  }
  0x12   :  { %24 = dma.hbm_to_vmem [thread:$0]  %s480_s1, 256, %s19_s16, [#allocation5], %s400_s25, %s400_s25, %s401_s26  }
  0x13   :  { %s402_s29 = smov [#allocation7]   ;;  %s349_s7 = scalar_lea.hbm %s481_s2, 2048 }
  0x14   :  { %s30_s30 = sshll.u32 %s402_s29, 4  ;;  %p350_p8 = scmp.ne.s32.totalorder %s481_s2, %s349_s7  ;;  %s31_s30 = int_to_ptr.vmem [resolvable:$true] %s30_s30 }
  0x15   :  { %p353_p9 = scmp.lt.u32.totalorder %s349_s7, %s481_s2 }
  0x17   :  { %p355_p10 = pnand %p353_p9, %p350_p8 }
  0x19   :  { %358 = shalt.err (!%p355_p10)
}
  0x1a   :  { %s359_s12 = scalar_lea.vmem %s31_s30, 2048  ;;  %p364_p12 = scmp.lt.s32.totalorder %s31_s30, %s31_s30 }
  0x1b   :  { %p360_p11 = scmp.ne.s32.totalorder %s31_s30, %s359_s12  ;;  %p365_p13 = scmp.lt.s32.totalorder %s359_s12, %s359_s12 }
  0x1d   :  { %p366_p0 = por %p365_p13, %p364_p12 }
  0x1f   :  { %p367_p1 = pnand %p366_p0, %p360_p11 }
  0x21   :  { %370 = shalt.err (!%p367_p1)
}
  0x22   :  { %s403_s1 = smov 64   ;;  %s404_s13 = smov 4  }
  0x23   :  { %36 = dma.hbm_to_vmem [thread:$0]  %s481_s2, 2048, %s31_s30, [#allocation8], %s403_s1, %s403_s1, %s404_s13  }
  0x24   :  { %393 = dma.done.wait [#allocation5], 256  }
  0x25   :  { %394 = vsyncadd [#allocation5], 4294967040 }
  0x26   :  { %395 = dma.done.wait [#allocation8], 2048  }
  0x27   :  { %396 = vsyncadd [#allocation8], 4294965248  ;;  %v308_v0 = vld [vmem:[#allocation7 + $0x40] sm:$0xff]   ;;  %v310_v2 = vld [vmem:[#allocation7 + $0x48] sm:$0xff]   ;;  %v228_v20 = vstv %s479_s0  ;;  %s405_s19 = smov [#allocation9]  }
  0x28   :  { %v309_v1 = vld [vmem:[#allocation7] sm:$0xff]   ;;  %279 = vmatprep.subr.bf16.mxu0 %v308_v0  ;;  %v311_v3 = vld [vmem:[#allocation7 + $0x8] sm:$0xff]   ;;  %v312_v4 = vld [vmem:[#allocation7 + $0x50] sm:$0xff]   ;;  %s247_s20 = sshll.u32 %s405_s19, 4  ;;  %s248_s20 = int_to_ptr.vmem [resolvable:$true] %s247_s20 }
  0x29   :  { %280 = vmatpush3.bf16.msra.mxu0 %v309_v1  ;;  %v313_v5 = vld [vmem:[#allocation7 + $0x10] sm:$0xff]   ;;  %v314_v6 = vld [vmem:[#allocation7 + $0x58] sm:$0xff]   ;;  %v316_v8 = vld [vmem:[#allocation7 + $0x60] sm:$0xff]   ;;  %s371_s21 = scalar_lea.vmem %s248_s20, 256  ;;  %p376_p3 = scmp.lt.s32.totalorder %s248_s20, %s248_s20 }
  0x2a   :  { %281 = vmatprep.subr.bf16.mxu0 %v310_v2  ;;  %v315_v7 = vld [vmem:[#allocation7 + $0x18] sm:$0xff]   ;;  %v317_v9 = vld [vmem:[#allocation7 + $0x20] sm:$0xff]   ;;  %v318_v10 = vld [vmem:[#allocation7 + $0x68] sm:$0xff]   ;;  %p372_p2 = scmp.ne.s32.totalorder %s248_s20, %s371_s21  ;;  %p377_p4 = scmp.lt.s32.totalorder %s371_s21, %s371_s21 }
  0x2b   :  { %v326_v11 = vld [vmem:[#allocation4 + $0x4] ss:$8 sps:$4 sm:$0xff]   ;;  %v319_v12 = vld [vmem:[#allocation7 + $0x28] sm:$0xff]   ;;  %v324_v17 = vld [vmem:[#allocation4] ss:$8 sps:$4 sm:$0xff]  }
  0x2c   :  { %218 = vmatprep.mubr.bf16.mxu0 %v326_v11  ;;  %v320_v13 = vld [vmem:[#allocation7 + $0x70] sm:$0xff]   ;;  %v322_v15 = vld [vmem:[#allocation7 + $0x78] sm:$0xff]   ;;  %p378_p5 = por %p377_p4, %p376_p3 }
  0x2d   :  { %282 = vmatpush3.bf16.msra.mxu0 %v311_v3  ;;  %v321_v14 = vld [vmem:[#allocation7 + $0x30] sm:$0xff]   ;;  %v323_v16 = vld [vmem:[#allocation7 + $0x38] sm:$0xff]  }
  0x2e   :  { %283 = vmatprep.subr.bf16.mxu0 %v312_v4  ;;  %v278_v23 = vld [vmem:[%s482_s3] ss:$0 sm:$0xff]  ;;  %p379_p6 = pnand %p378_p5, %p372_p2 }
  0x31   :  { %284 = vmatpush3.bf16.msra.mxu0 %v313_v5 }
  0x32   :  { %285 = vmatprep.subr.bf16.mxu0 %v314_v6 }
  0x35   :  { %286 = vmatpush3.bf16.msra.mxu0 %v315_v7 }
  0x36   :  { %287 = vmatprep.subr.bf16.mxu0 %v316_v8 }
  0x39   :  { %288 = vmatpush3.bf16.msra.mxu0 %v317_v9 }
  0x3a   :  { %289 = vmatprep.subr.bf16.mxu0 %v318_v10 }
  0x3d   :  { %290 = vmatpush3.bf16.msra.mxu0 %v319_v12 }
  0x3e   :  { %291 = vmatprep.subr.bf16.mxu0 %v320_v13 }
  0x41   :  { %292 = vmatpush3.bf16.msra.mxu0 %v321_v14 }
  0x42   :  { %293 = vmatprep.subr.bf16.mxu0 %v322_v15 }
  0x45   :  { %294 = vmatpush3.bf16.msra.mxu0 %v323_v16 }
  0x48   :  { %219 = vmatmul.mubr.bf16.vlgmr.msra.gmra.mrb[0].mxu0 %v324_v17 }
 0x11b   :  { %v295_v18 = vpop.f32.mrb[0].mxu0 }
 0x11c   :  { %v296_v19 = vpop.f32.mrb[1].mxu0 }
 0x11d   :  { %v297_v21 = vadd.f32 %v296_v19, %v295_v18  ;;  %v298_v22 = vpop.f32.mrb[2].mxu0 }
 0x11e   :  { %v299_v24 = vpop.f32.mrb[3].mxu0 }
 0x11f   :  { %v229_v25 = vmul.f32 %v297_v21, %v228_v20  ;;  %v300_v26 = vadd.f32 %v299_v24, %v298_v22 }
 0x121   :  { %v238_v27 = vadd.f32 %v278_v23, %v229_v25  ;;  %v230_v28 = vmul.f32 %v300_v26, %v228_v20 }
 0x123   :  { %240 = vst [vmem:[#allocation9] sm:$0xff] %v238_v27  ;;  %v239_v29 = vadd.f32 %v278_v23, %v230_v28 }
 0x125   :  { %241 = vst [vmem:[#allocation9 + $0x8] sm:$0xff] %v239_v29 }
 0x126   :  { %382 = shalt.err (!%p379_p6)
}
 0x127   :  { %s383_s22 = scalar_lea.hbm %s483_s4, 256 }
 0x128   :  { %p384_p7 = scmp.ne.s32.totalorder %s483_s4, %s383_s22  ;;  %p387_p8 = scmp.lt.u32.totalorder %s383_s22, %s483_s4 }
 0x12a   :  { %p389_p9 = pnand %p387_p8, %p384_p7 }
 0x12c   :  { %392 = shalt.err (!%p389_p9)
}
 0x12d   :  { %253 = dma.vmem_to_hbm [thread:$0]  %s248_s20, 256, %s483_s4, [#allocation6], %s400_s25, %s400_s25, %s401_s26  }
 0x12e   :  { %397 = dma.done.wait [#allocation6], 256  }
 0x12f   :  { %398 = vsyncadd [#allocation6], 4294967040 }
 0x130   :  { %257 = vsyncpa [#allocation5], 1 }
 0x131   :  { %258 = vsyncpa [#allocation8], 1 }
 0x132   :  { %259 = vsyncpa [#allocation6], 1 }

</bundles_post_ra>
